<compile_context>
chip_gen: v7x
topology: tpu7x:2x2x1
jax: 0.10.0
libtpu: 0.0.40
codegen_flags: <defaults>
</compile_context>

<pallas_src>
import functools

import jax
import jax.numpy as jnp
import numpy as np
from jax.experimental import pallas as pl
from jax.experimental.pallas import tpu as pltpu

_LANE = 128     # TPU lane width (last-dim vreg extent)
_ROWQ = 32      # row-block quantum: covers f32/bf16/int8 sublane packing


def _round_up(x, m):
    return (x + m - 1) // m * m


def _as_small_nonneg_int(g):
    """Return g as a python int if it is a small non-negative integer, else None."""
    try:
        gf = float(g)
    except (TypeError, ValueError):
        return None
    if gf < 0 or gf > 16 or gf != int(gf):
        return None
    return int(gf)


def _int_pow(x, n):
    """x**n for a small non-negative python-int n via repeated squaring (VPU only)."""
    if n == 0:
        return jnp.ones_like(x)
    result = None
    p = x
    while n:
        if n & 1:
            result = p if result is None else result * p
        n >>= 1
        if n:
            p = p * p
    return result


def _asl_kernel(pred_ref, label_ref, negw_ref, dw_ref, out_ref, *,
                gamma_neg, gamma_pos, clip, eps, hard_labels, approx_sigmoid):
    # The output block changes only with the (parallel) row-block axis; the
    # lane-block axis (trailing, "arbitrary") accumulates into the same block.
    @pl.when(pl.program_id(1) == 0)
    def _init():
        out_ref[...] = jnp.zeros_like(out_ref)

    pred = pred_ref[...].astype(jnp.float32)
    label = label_ref[...].astype(jnp.float32)
    negw = negw_ref[...]          # (1, 128): broadcasts over the row axis
    dw = dw_ref[...]              # pos_weights - neg_weights, same layout

    # weight = label*posw + (1-label)*negw, algebraically folded (1 mul + 1 add).
    weight = negw + label * dw

    # Sigmoid.
    denom = 1.0 + jnp.exp(-pred)
    if approx_sigmoid:
        xs_pos = pl.reciprocal(denom, approx=True)    # EUP vrcp, no refinement
    else:
        xs_pos = 1.0 / denom
    xs_neg = 1.0 - xs_pos
    if clip is not None and clip > 0:
        # torch: xs_neg.add_(clip).clamp_(max=1)  (in-place -> also feeds pt)
        xs_neg = jnp.minimum(xs_neg + clip, 1.0)

    gp_int = _as_small_nonneg_int(gamma_pos)
    gn_int = _as_small_nonneg_int(gamma_neg)
    use_focal = (gamma_neg > 0) or (gamma_pos > 0)

    if hard_labels:
        # label in {0,1}: select first, then take a single log (halves log traffic).
        is_pos = label > 0.5
        p_sel = jnp.where(is_pos, xs_pos, xs_neg)     # == pt of the torch code
        loss = jnp.log(jnp.maximum(p_sel, eps)) * weight
        if use_focal:
            base = 1.0 - p_sel
            if gp_int is not None and gn_int is not None:
                # Integer gammas: pow via repeated squaring -> no exp/log on EUP.
                one_sided_w = jnp.where(is_pos, _int_pow(base, gp_int),
                                        _int_pow(base, gn_int))
            else:
                g = gamma_neg + label * (gamma_pos - gamma_neg)
                pw = jnp.exp(g * jnp.log(jnp.maximum(base, 1e-30)))
                one_sided_w = jnp.where(base > 0.0, pw,
                                        jnp.where(g == 0.0, 1.0, 0.0))
            loss = loss * one_sided_w
    else:
        # General (soft-label capable) path: transliteration of the torch forward.
        log_pos = jnp.log(jnp.maximum(xs_pos, eps))
        log_neg = jnp.log(jnp.maximum(xs_neg, eps))
        loss = (log_neg + label * (log_pos - log_neg)) * weight
        if use_focal:
            pt = xs_neg + label * (xs_pos - xs_neg)
            base = 1.0 - pt
            g = gamma_neg + label * (gamma_pos - gamma_neg)
            pw = jnp.exp(g * jnp.log(jnp.maximum(base, 1e-30)))
            one_sided_w = jnp.where(base > 0.0, pw,
                                    jnp.where(g == 0.0, 1.0, 0.0))
            loss = loss * one_sided_w

    # Fold the (block_rows, 128) tile into a single-vreg (8, 128) partial sum.
    # The reshape splits the sublane axis at native-tile boundaries (free) and
    # the leading-axis sum is pure VPU adds, so the per-step output RMW is one
    # vreg.
    br = loss.shape[0]
    partial = jnp.sum(loss.reshape(br // 8, 8, _LANE), axis=0)
    out_ref[...] += partial[None, :, :]


def asl_with_class_weight(pred, label, pos_weights, neg_weights, *,
                          gamma_neg=4, gamma_pos=1, clip=0.05, eps=1e-8,
                          block_rows=1024, hard_labels=True,
                          approx_sigmoid=False):
    """Forward pass of ASLwithClassWeight; returns the scalar -mean(loss).

    hard_labels=True assumes label values are in {0, 1} (the intended usage of
    ASL); set hard_labels=False for soft labels (exact transliteration of the
    torch forward).
    """
    N, C = pred.shape
    total = N * C
    posw = jnp.asarray(pos_weights, jnp.float32).reshape(-1)
    negw = jnp.asarray(neg_weights, jnp.float32).reshape(-1)
    dw = posw - negw

    if _LANE % C == 0:
        # Lane-dense repack: fold the class axis into the 128-lane dimension.
        reps = _LANE // C
        negw_row = jnp.tile(negw, reps)[None, :]
        dw_row = jnp.tile(dw, reps)[None, :]
        lane_total = _LANE
        n_rows = _round_up(total, _LANE) // _LANE
        br = _round_up(min(block_rows, _round_up(n_rows, _ROWQ)), _ROWQ)
        rows_pad = _round_up(n_rows, br)
        flat_p = pred.reshape(-1)
        flat_l = label.reshape(-1)
        pad = rows_pad * _LANE - total
        if pad:
            # pred=+40, label=1 padding contributes exactly zero loss.
            flat_p = jnp.concatenate(
                [flat_p, jnp.full((pad,), 40.0, flat_p.dtype)])
            flat_l = jnp.concatenate(
                [flat_l, jnp.full((pad,), 1, flat_l.dtype)])
        pred2 = flat_p.reshape(rows_pad, _LANE)
        label2 = flat_l.reshape(rows_pad, _LANE)
    else:
        # Pad the class axis to a multiple of 128; padded classes get ZERO weight
        # (=> zero loss), padded rows use the zero-loss (pred=40, label=1) fill.
        lane_total = _round_up(C, _LANE)
        negw_row = jnp.zeros((lane_total,), jnp.float32).at[:C].set(negw)[None, :]
        dw_row = jnp.zeros((lane_total,), jnp.float32).at[:C].set(dw)[None, :]
        n_rows = N
        br = _round_up(min(block_rows, _round_up(n_rows, _ROWQ)), _ROWQ)
        rows_pad = _round_up(n_rows, br)
        if rows_pad == N and lane_total == C:
            pred2, label2 = pred, label
        else:
            pred2 = jnp.full((rows_pad, lane_total), 40.0,
                             pred.dtype).at[:N, :C].set(pred)
            label2 = jnp.full((rows_pad, lane_total), 1,
                              label.dtype).at[:N, :C].set(label)

    n_rb = rows_pad // br
    n_lb = lane_total // _LANE

    kernel = functools.partial(
        _asl_kernel, gamma_neg=gamma_neg, gamma_pos=gamma_pos, clip=clip,
        eps=eps, hard_labels=hard_labels, approx_sigmoid=approx_sigmoid)

    partials = pl.pallas_call(
        kernel,
        out_shape=jax.ShapeDtypeStruct((n_rb, 8, _LANE), jnp.float32),
        grid_spec=pltpu.PrefetchScalarGridSpec(
            num_scalar_prefetch=0,
            grid=(n_rb, n_lb),
            in_specs=[
                pl.BlockSpec((br, _LANE), lambda i, j: (i, j)),   # pred
                pl.BlockSpec((br, _LANE), lambda i, j: (i, j)),   # label
                pl.BlockSpec((1, _LANE), lambda i, j: (0, j)),    # neg_weights row
                pl.BlockSpec((1, _LANE), lambda i, j: (0, j)),    # (pos-neg) row
            ],
            out_specs=pl.BlockSpec((1, 8, _LANE), lambda i, j: (i, 0, 0)),
        ),
        compiler_params=pltpu.CompilerParams(
            dimension_semantics=("parallel", "arbitrary"),
            vmem_limit_bytes=32 * 1024 * 1024),
    )(pred2, label2, negw_row, dw_row)

    # Final tiny reduce + mean + negate in the wrapper.
    return -(jnp.sum(partials) / total)


def _asl_reference(pred, label, posw, negw, gamma_neg=4, gamma_pos=1,
                   clip=0.05, eps=1e-8):
    weight = label * posw + (1.0 - label) * negw
    xs_pos = jax.nn.sigmoid(pred)
    xs_neg = 1.0 - xs_pos
    if clip is not None and clip > 0:
        xs_neg = jnp.minimum(xs_neg + clip, 1.0)
    los_pos = label * jnp.log(jnp.maximum(xs_pos, eps))
    los_neg = (1.0 - label) * jnp.log(jnp.maximum(xs_neg, eps))
    loss = (los_pos + los_neg) * weight
    if gamma_neg > 0 or gamma_pos > 0:
        pt = xs_pos * label + xs_neg * (1.0 - label)
        g = gamma_pos * label + gamma_neg * (1.0 - label)
        loss = loss * jnp.power(1.0 - pt, g)
    return -jnp.mean(loss)


if __name__ == "__main__":
    key = jax.random.PRNGKey(0)
    k1, k2, k3, k4, k5, k6, k7 = jax.random.split(key, 7)

    # --- Config 1: small multi-label problem (lane-dense repack path). ---
    N, C = 16, 16
    class_instance_nums = jax.random.randint(k3, (C,), 1, 100).astype(jnp.float32)
    total_instance_num = 200.0
    p = class_instance_nums / total_instance_num
    pos_weights = jnp.exp(1.0 - p)
    neg_weights = jnp.exp(p)

    pred = jax.random.normal(k1, (N, C), dtype=jnp.float32) * 2.0
    label = (jax.random.uniform(k2, (N, C)) > 0.6).astype(jnp.float32)

    ref = _asl_reference(pred, label, pos_weights, neg_weights)

    out = jax.block_until_ready(
        asl_with_class_weight(pred, label, pos_weights, neg_weights))
    np.testing.assert_allclose(np.asarray(out), np.asarray(ref),
                               rtol=1e-5, atol=1e-6)

    # General (soft-label capable) fallback path, same data.
    out_general = jax.block_until_ready(
        asl_with_class_weight(pred, label, pos_weights, neg_weights,
                              hard_labels=False))
    np.testing.assert_allclose(np.asarray(out_general), np.asarray(ref),
                               rtol=1e-5, atol=1e-6)

    # Soft labels (strict transliteration of the torch forward).
    label_soft = jax.random.uniform(k7, (N, C), dtype=jnp.float32)
    ref_soft = _asl_reference(pred, label_soft, pos_weights, neg_weights)
    out_soft = jax.block_until_ready(
        asl_with_class_weight(pred, label_soft, pos_weights, neg_weights,
                              hard_labels=False))
    np.testing.assert_allclose(np.asarray(out_soft), np.asarray(ref_soft),
                               rtol=1e-5, atol=1e-6)

    # Approximate-reciprocal sigmoid (EUP vrcp): looser tolerance by design.
    out_approx = jax.block_until_ready(
        asl_with_class_weight(pred, label, pos_weights, neg_weights,
                              approx_sigmoid=True))
    np.testing.assert_allclose(np.asarray(out_approx), np.asarray(ref),
                               rtol=5e-2, atol=1e-3)

    # --- Config 2: C not dividing 128 -> padded-column path + row padding. ---
    N2, C2 = 40, 24
    cin2 = jax.random.randint(k6, (C2,), 1, 100).astype(jnp.float32)
    p2 = cin2 / 150.0
    posw2 = jnp.exp(1.0 - p2)
    negw2 = jnp.exp(p2)
    pred_b = jax.random.normal(k4, (N2, C2), dtype=jnp.float32) * 2.0
    label_b = (jax.random.uniform(k5, (N2, C2)) > 0.5).astype(jnp.float32)

    ref2 = _asl_reference(pred_b, label_b, posw2, negw2)
    out2 = jax.block_until_ready(
        asl_with_class_weight(pred_b, label_b, posw2, negw2))
    np.testing.assert_allclose(np.asarray(out2), np.asarray(ref2),
                               rtol=1e-5, atol=1e-6)

    # --- Config 3: multiple row blocks -> exercises the "parallel" row axis. ---
    N3, C3 = 3000, 16
    pred_c = jax.random.normal(k4, (N3, C3), dtype=jnp.float32) * 2.0
    label_c = (jax.random.uniform(k5, (N3, C3)) > 0.7).astype(jnp.float32)
    ref3 = _asl_reference(pred_c, label_c, pos_weights, neg_weights)
    out3 = jax.block_until_ready(
        asl_with_class_weight(pred_c, label_c, pos_weights, neg_weights,
                              block_rows=128))
    np.testing.assert_allclose(np.asarray(out3), np.asarray(ref3),
                               rtol=1e-5, atol=1e-6)

    print("KERNEL_OK")
</pallas_src>

<mosaic_0001>
module attributes {stable_mosaic.version = 11 : i64} {
  func.func @_asl_kernel(%arg0: i32, %arg1: i32, %arg2: memref<32x128xf32, #tpu.memory_space<vmem>>, %arg3: memref<32x128xf32, #tpu.memory_space<vmem>>, %arg4: memref<1x128xf32, #tpu.memory_space<vmem>>, %arg5: memref<1x128xf32, #tpu.memory_space<vmem>>, %arg6: memref<1x8x128xf32, #tpu.memory_space<vmem>>) attributes {dimension_semantics = [#tpu.dimension_semantics<parallel>, #tpu.dimension_semantics<arbitrary>], iteration_bounds = array<i64: 1, 1>, scalar_prefetch = 0 : i64, scratch_operands = 0 : i64, tpu.core_type = #tpu.core_type<tc>, window_params = [{transform_indices = @transform_0, window_bounds = array<i64: 32, 128>}, {transform_indices = @transform_1, window_bounds = array<i64: 32, 128>}, {transform_indices = @transform_2, window_bounds = array<i64: 1, 128>}, {transform_indices = @transform_3, window_bounds = array<i64: 1, 128>}, {transform_indices = @transform_4, window_bounds = array<i64: 1, 8, 128>}]} {
    %c0_i32 = arith.constant 0 : i32
    %0 = arith.cmpi eq, %arg1, %c0_i32 : i32
    %1 = arith.extui %0 : i1 to i32
    %c0_i32_0 = arith.constant 0 : i32
    %2 = arith.cmpi ne, %1, %c0_i32_0 : i32
    scf.if %2 {
      %cst_23 = arith.constant 0.000000e+00 : f32
      %43 = vector.broadcast %cst_23 : f32 to vector<1x8x128xf32>
      %c0_24 = arith.constant 0 : index
      %c0_25 = arith.constant 0 : index
      %c0_26 = arith.constant 0 : index
      %44 = vector.load %arg6[%c0_24, %c0_25, %c0_26] : memref<1x8x128xf32, #tpu.memory_space<vmem>>, vector<1x8x128xf32>
      tpu.vector_store %arg6[%c0_24, %c0_25, %c0_26], %43 {strides = array<i32>} : memref<1x8x128xf32, #tpu.memory_space<vmem>>, vector<1x8x128xf32>,
    } else {
    }
    %c0 = arith.constant 0 : index
    %c0_1 = arith.constant 0 : index
    %3 = vector.load %arg2[%c0, %c0_1] : memref<32x128xf32, #tpu.memory_space<vmem>>, vector<32x128xf32>
    %c0_2 = arith.constant 0 : index
    %c0_3 = arith.constant 0 : index
    %4 = vector.load %arg3[%c0_2, %c0_3] : memref<32x128xf32, #tpu.memory_space<vmem>>, vector<32x128xf32>
    %c0_4 = arith.constant 0 : index
    %c0_5 = arith.constant 0 : index
    %5 = vector.load %arg4[%c0_4, %c0_5] : memref<1x128xf32, #tpu.memory_space<vmem>>, vector<1x128xf32>
    %c0_6 = arith.constant 0 : index
    %c0_7 = arith.constant 0 : index
    %6 = vector.load %arg5[%c0_6, %c0_7] : memref<1x128xf32, #tpu.memory_space<vmem>>, vector<1x128xf32>
    %7 = vector.broadcast %6 : vector<1x128xf32> to vector<32x128xf32>
    %8 = arith.mulf %4, %7 : vector<32x128xf32>
    %9 = vector.broadcast %5 : vector<1x128xf32> to vector<32x128xf32>
    %10 = arith.addf %9, %8 : vector<32x128xf32>
    %cst = arith.constant 0.000000e+00 : f32
    %11 = vector.broadcast %cst : f32 to vector<32x128xf32>
    %12 = arith.subf %11, %3 : vector<32x128xf32>
    %13 = math.exp %12 : vector<32x128xf32>
    %cst_8 = arith.constant 1.000000e+00 : f32
    %14 = vector.broadcast %cst_8 : f32 to vector<32x128xf32>
    %15 = arith.addf %14, %13 : vector<32x128xf32>
    %cst_9 = arith.constant 1.000000e+00 : f32
    %16 = vector.broadcast %cst_9 : f32 to vector<32x128xf32>
    %17 = arith.divf %16, %15 : vector<32x128xf32>
    %cst_10 = arith.constant 1.000000e+00 : f32
    %18 = vector.broadcast %cst_10 : f32 to vector<32x128xf32>
    %19 = arith.subf %18, %17 : vector<32x128xf32>
    %cst_11 = arith.constant 5.000000e-02 : f32
    %20 = vector.broadcast %cst_11 : f32 to vector<32x128xf32>
    %21 = arith.addf %19, %20 : vector<32x128xf32>
    %cst_12 = arith.constant 1.000000e+00 : f32
    %22 = vector.broadcast %cst_12 : f32 to vector<32x128xf32>
    %23 = arith.minimumf %21, %22 : vector<32x128xf32>
    %cst_13 = arith.constant 5.000000e-01 : f32
    %24 = vector.broadcast %cst_13 : f32 to vector<32x128xf32>
    %25 = arith.cmpf ogt, %4, %24 : vector<32x128xf32>
    %26 = arith.select %25, %17, %23 : vector<32x128xi1>, vector<32x128xf32>
    %cst_14 = arith.constant 9.99999993E-9 : f32
    %27 = vector.broadcast %cst_14 : f32 to vector<32x128xf32>
    %28 = arith.maximumf %26, %27 : vector<32x128xf32>
    %29 = math.log %28 : vector<32x128xf32>
    %30 = arith.mulf %29, %10 : vector<32x128xf32>
    %cst_15 = arith.constant 1.000000e+00 : f32
    %31 = vector.broadcast %cst_15 : f32 to vector<32x128xf32>
    %32 = arith.subf %31, %26 : vector<32x128xf32>
    %33 = arith.mulf %32, %32 : vector<32x128xf32>
    %34 = arith.mulf %33, %33 : vector<32x128xf32>
    %35 = arith.select %25, %32, %34 : vector<32x128xi1>, vector<32x128xf32>
    %36 = arith.mulf %30, %35 : vector<32x128xf32>
    %37 = vector.shape_cast %36 : vector<32x128xf32> to vector<4x8x128xf32>
    %cst_16 = arith.constant dense<0.000000e+00> : vector<8x128xf32>
    %38 = vector.multi_reduction <add>, %37, %cst_16 [0] : vector<4x8x128xf32> to vector<8x128xf32>
    %c0_17 = arith.constant 0 : index
    %c0_18 = arith.constant 0 : index
    %c0_19 = arith.constant 0 : index
    %39 = vector.load %arg6[%c0_17, %c0_18, %c0_19] : memref<1x8x128xf32, #tpu.memory_space<vmem>>, vector<1x8x128xf32>
    %40 = vector.shape_cast %38 : vector<8x128xf32> to vector<1x8x128xf32>
    %41 = arith.addf %39, %40 : vector<1x8x128xf32>
    %c0_20 = arith.constant 0 : index
    %c0_21 = arith.constant 0 : index
    %c0_22 = arith.constant 0 : index
    %42 = vector.load %arg6[%c0_20, %c0_21, %c0_22] : memref<1x8x128xf32, #tpu.memory_space<vmem>>, vector<1x8x128xf32>
    tpu.vector_store %arg6[%c0_20, %c0_21, %c0_22], %41 {strides = array<i32>} : memref<1x8x128xf32, #tpu.memory_space<vmem>>, vector<1x8x128xf32>,
    return
  }
  func.func @transform_0(%arg0: i32, %arg1: i32) -> (i32, i32) {
    %c0_i32 = arith.constant 0 : i32
    return %arg0, %arg1 : i32, i32
  }
  func.func @transform_1(%arg0: i32, %arg1: i32) -> (i32, i32) {
    %c0_i32 = arith.constant 0 : i32
    return %arg0, %arg1 : i32, i32
  }
  func.func @transform_2(%arg0: i32, %arg1: i32) -> (i32, i32) {
    %c0_i32 = arith.constant 0 : i32
    %c0_i32_0 = arith.constant 0 : i32
    return %c0_i32, %arg1 : i32, i32
  }
  func.func @transform_3(%arg0: i32, %arg1: i32) -> (i32, i32) {
    %c0_i32 = arith.constant 0 : i32
    %c0_i32_0 = arith.constant 0 : i32
    return %c0_i32, %arg1 : i32, i32
  }
  func.func @transform_4(%arg0: i32, %arg1: i32) -> (i32, i32, i32) {
    %c0_i32 = arith.constant 0 : i32
    %c0_i32_0 = arith.constant 0 : i32
    %c0_i32_1 = arith.constant 0 : i32
    return %arg0, %c0_i32, %c0_i32_0 : i32, i32, i32
  }
}

</mosaic_0001>

<bundles_post_ra>
// kernel: tpu_custom_call.1
= control target key start
LH: loop header
LB: loop body
LE: loop exit
PB: predicated region body
PF: predicated region fallthrough
CT: control target
= control target key end

     0   :  { %9 = vsyncpa [#allocation3], 0  ;;  %s385_s0 = inlined_call_operand.hbm [shape: f32[32,128], index: 0, kind: input, shape index: {}]   ;;  %s386_s1 = inlined_call_operand.hbm [shape: f32[32,128], index: 1, kind: input, shape index: {}]   ;;  %s387_s2 = inlined_call_operand.vmem [shape: f32[1,128], index: 2, kind: input, shape index: {}]   ;;  %s388_s3 = inlined_call_operand.vmem [shape: f32[1,128], index: 3, kind: input, shape index: {}]   ;;  %s389_s4 = inlined_call_operand.hbm [shape: f32[1,8,128], index: 4, kind: output, shape index: {}]  }
   0x1   :  { %10 = vsyncpa [#allocation6], 0 }
   0x2   :  { %11 = vsyncpa [#allocation4], 0  ;;  %s287_s15 = smov [#allocation2]   ;;  %s215_s19 = scalar_lea.hbm %s385_s0, 512 }
   0x3   :  { %s17_s16 = sshll.u32 %s287_s15, 4  ;;  %p216_p0 = scmp.ne.s32.totalorder %s385_s0, %s215_s19  ;;  %s18_s16 = int_to_ptr.vmem [resolvable:$true] %s17_s16 }
   0x4   :  { %p219_p1 = scmp.lt.u32.totalorder %s215_s19, %s385_s0 }
   0x6   :  { %p221_p2 = pnand %p219_p1, %p216_p0 }
   0x8   :  { %224 = shalt.err (!%p221_p2)
}
   0x9   :  { %s225_s24 = scalar_lea.vmem %s18_s16, 512  ;;  %p230_p4 = scmp.lt.s32.totalorder %s18_s16, %s18_s16 }
   0xa   :  { %p226_p3 = scmp.ne.s32.totalorder %s18_s16, %s225_s24  ;;  %p231_p5 = scmp.lt.s32.totalorder %s225_s24, %s225_s24 }
   0xc   :  { %p232_p6 = por %p231_p5, %p230_p4 }
   0xe   :  { %p233_p7 = pnand %p232_p6, %p226_p3 }
  0x10   :  { %236 = shalt.err (!%p233_p7)
}
  0x11   :  { %s288_s25 = smov 128   ;;  %s289_s26 = smov 8  }
  0x12   :  { %23 = dma.hbm_to_vmem [thread:$0]  %s385_s0, 512, %s18_s16, [#allocation3], %s288_s25, %s288_s25, %s289_s26  }
  0x13   :  { %s290_s29 = smov [#allocation5]   ;;  %s237_s7 = scalar_lea.hbm %s386_s1, 512 }
  0x14   :  { %s29_s30 = sshll.u32 %s290_s29, 4  ;;  %p238_p8 = scmp.ne.s32.totalorder %s386_s1, %s237_s7  ;;  %s30_s30 = int_to_ptr.vmem [resolvable:$true] %s29_s30 }
  0x15   :  { %p241_p9 = scmp.lt.u32.totalorder %s237_s7, %s386_s1 }
  0x17   :  { %p243_p10 = pnand %p241_p9, %p238_p8 }
  0x19   :  { %246 = shalt.err (!%p243_p10)
}
  0x1a   :  { %s247_s12 = scalar_lea.vmem %s30_s30, 512  ;;  %p252_p12 = scmp.lt.s32.totalorder %s30_s30, %s30_s30 }
  0x1b   :  { %p248_p11 = scmp.ne.s32.totalorder %s30_s30, %s247_s12  ;;  %p253_p13 = scmp.lt.s32.totalorder %s247_s12, %s247_s12 }
  0x1d   :  { %p254_p0 = por %p253_p13, %p252_p12 }
  0x1f   :  { %p255_p1 = pnand %p254_p0, %p248_p11 }
  0x21   :  { %258 = shalt.err (!%p255_p1)
}
  0x22   :  { %35 = dma.hbm_to_vmem [thread:$0]  %s386_s1, 512, %s30_s30, [#allocation6], %s288_s25, %s288_s25, %s289_s26  }
  0x23   :  { %281 = dma.done.wait [#allocation3], 512  }
  0x24   :  { %282 = vsyncadd [#allocation3], 4294966784 }
  0x25   :  { %283 = dma.done.wait [#allocation6], 512  }
  0x26   :  { %284 = vsyncadd [#allocation6], 4294966784  ;;  %v51_v0 = vld [vmem:[#allocation2] sm:$0xff]  ;;  %v52_v1 = vld [vmem:[#allocation2 + $0x8] sm:$0xff] }
  0x27   :  { %v53_v2 = vld [vmem:[#allocation2 + $0x10] sm:$0xff]  ;;  %v54_v3 = vld [vmem:[#allocation2 + $0x18] sm:$0xff]  ;;  %v81_v4 = vsub.f32 0.0, %v51_v0  ;;  %v82_v5 = vsub.f32 0.0, %v52_v1  ;;  %v55_v21 = vld [vmem:[#allocation5] sm:$0xff] }
  0x28   :  { %v83_v6 = vsub.f32 0.0, %v53_v2  ;;  %v84_v7 = vsub.f32 0.0, %v54_v3  ;;  %v341_v25 = vld [vmem:[#allocation5 + $0x8] sm:$0xff]  ;;  %v343_v29 = vld [vmem:[#allocation5 + $0x10] sm:$0xff]  ;;  %vm117_vm0 = vcmp.gt.f32.partialorder %v55_v21, 0.5  ;;  %v345_v31 = vld [vmem:[#allocation5 + $0x18] sm:$0xff] }
  0x29   :  { %v85_v8 = vmul.f32 1.442695, %v81_v4  ;;  %v87_v9 = vmul.f32 1.442695, %v82_v5  ;;  %vm118_vm1 = vcmp.gt.f32.partialorder %v341_v25, 0.5  ;;  %vm119_vm2 = vcmp.gt.f32.partialorder %v343_v29, 0.5 }
  0x2a   :  { %v89_v10 = vmul.f32 1.442695, %v83_v6  ;;  %v91_v11 = vmul.f32 1.442695, %v84_v7  ;;  %vm120_vm3 = vcmp.gt.f32.partialorder %v345_v31, 0.5 }
  0x2b   :  { %191 = vpow2.f32 %v85_v8  ;;  %v183_v48 = vld [vmem:[%s388_s3] ss:$0 sm:$0xff] }
  0x2c   :  { %193 = vpow2.f32 %v87_v9  ;;  %v67_v54 = vmul.f32 %v183_v48, %v55_v21  ;;  %v184_v55 = vld [vmem:[%s387_s2] ss:$0 sm:$0xff]  ;;  %v68_v57 = vmul.f32 %v183_v48, %v341_v25  ;;  %v69_v59 = vmul.f32 %v183_v48, %v343_v29  ;;  %s291_s2 = smov [#allocation7]  }
  0x2d   :  { %195 = vpow2.f32 %v89_v10  ;;  %v70_v62 = vmul.f32 %v183_v48, %v345_v31  ;;  %s173_s3 = sshll.u32 %s291_s2, 4  ;;  %s174_s3 = int_to_ptr.vmem [resolvable:$true] %s173_s3 }
  0x2e   :  { %197 = vpow2.f32 %v91_v11  ;;  %v77_v63 = vadd.f32 %v184_v55, %v67_v54  ;;  %v78_v2 = vadd.f32 %v184_v55, %v68_v57  ;;  %v79_v6 = vadd.f32 %v184_v55, %v69_v59  ;;  %s259_s17 = scalar_lea.vmem %s174_s3, 128  ;;  %p264_p3 = scmp.lt.s32.totalorder %s174_s3, %s174_s3 }
  0x2f   :  { %v80_v10 = vadd.f32 %v184_v55, %v70_v62  ;;  %p260_p2 = scmp.ne.s32.totalorder %s174_s3, %s259_s17  ;;  %p265_p4 = scmp.lt.s32.totalorder %s259_s17, %s259_s17 }
  0x31   :  { %p266_p5 = por %p265_p4, %p264_p3 }
  0x33   :  { %p267_p6 = pnand %p266_p5, %p260_p2 }
  0x35   :  { %v192_v12 = vpop.eup %191 }
  0x36   :  { %v93_v13 = vadd.f32 1.0, %v192_v12  ;;  %v194_v14 = vpop.eup %193 }
  0x37   :  { %v196_v15 = vpop.eup %195  ;;  %v94_v16 = vadd.f32 1.0, %v194_v14 }
  0x38   :  { %199 = vrcp.f32 %v93_v13  ;;  %v198_v17 = vpop.eup %197  ;;  %v95_v18 = vadd.f32 1.0, %v196_v15 }
  0x39   :  { %v96_v19 = vadd.f32 1.0, %v198_v17  ;;  %201 = vrcp.f32 %v94_v16 }
  0x3a   :  { %203 = vrcp.f32 %v95_v18 }
  0x3b   :  { %205 = vrcp.f32 %v96_v19 }
  0x42   :  { %v200_v20 = vpop.eup %199 }
  0x43   :  { %v105_v22 = vsub.f32 1.0, %v200_v20  ;;  %v202_v23 = vpop.eup %201 }
  0x44   :  { %v204_v24 = vpop.eup %203  ;;  %v106_v26 = vsub.f32 1.0, %v202_v23 }
  0x45   :  { %v109_v27 = vadd.f32 0.05, %v105_v22  ;;  %v206_v28 = vpop.eup %205  ;;  %v107_v30 = vsub.f32 1.0, %v204_v24 }
  0x46   :  { %v108_v32 = vsub.f32 1.0, %v206_v28  ;;  %v110_v33 = vadd.f32 0.05, %v106_v26 }
  0x47   :  { %v113_v34 = vmin.f32 %v109_v27, 1.0  ;;  %v111_v35 = vadd.f32 0.05, %v107_v30 }
  0x48   :  { %v112_v36 = vadd.f32 0.05, %v108_v32  ;;  %v114_v37 = vmin.f32 %v110_v33, 1.0 }
  0x49   :  { %v121_v38 = vsel %vm117_vm0, %v200_v20, %v113_v34  ;;  %v115_v39 = vmin.f32 %v111_v35, 1.0 }
  0x4a   :  { %v125_v40 = vmax.f32 %v121_v38, 1e-08  ;;  %v116_v41 = vmin.f32 %v112_v36, 1.0  ;;  %v122_v42 = vsel %vm118_vm1, %v202_v23, %v114_v37  ;;  %v141_v45 = vsub.f32 1.0, %v121_v38 }
  0x4b   :  { %v123_v43 = vsel %vm119_vm2, %v204_v24, %v115_v39  ;;  %v126_v44 = vmax.f32 %v122_v42, 1e-08  ;;  %v142_v50 = vsub.f32 1.0, %v122_v42 }
  0x4c   :  { %207 = vlog2.f32 %v125_v40  ;;  %v124_v46 = vsel %vm120_vm3, %v206_v28, %v116_v41  ;;  %v127_v47 = vmax.f32 %v123_v43, 1e-08  ;;  %v143_v51 = vsub.f32 1.0, %v123_v43 }
  0x4d   :  { %v128_v49 = vmax.f32 %v124_v46, 1e-08  ;;  %209 = vlog2.f32 %v126_v44  ;;  %v144_v52 = vsub.f32 1.0, %v124_v46  ;;  %v145_v53 = vmul.f32 %v141_v45, %v141_v45 }
  0x4e   :  { %211 = vlog2.f32 %v127_v47  ;;  %v146_v56 = vmul.f32 %v142_v50, %v142_v50  ;;  %v147_v58 = vmul.f32 %v143_v51, %v143_v51 }
  0x4f   :  { %213 = vlog2.f32 %v128_v49  ;;  %v148_v60 = vmul.f32 %v144_v52, %v144_v52  ;;  %v149_v61 = vmul.f32 %v145_v53, %v145_v53 }
  0x50   :  { %v150_v1 = vmul.f32 %v146_v56, %v146_v56  ;;  %v151_v4 = vmul.f32 %v147_v58, %v147_v58 }
  0x51   :  { %v152_v7 = vmul.f32 %v148_v60, %v148_v60  ;;  %v153_v8 = vsel %vm117_vm0, %v141_v45, %v149_v61 }
  0x52   :  { %v154_v15 = vsel %vm118_vm1, %v142_v50, %v150_v1  ;;  %v155_v18 = vsel %vm119_vm2, %v143_v51, %v151_v4 }
  0x53   :  { %v156_v21 = vsel %vm120_vm3, %v144_v52, %v152_v7 }
  0x56   :  { %v208_v0 = vpop.eup %207 }
  0x57   :  { %v130_v3 = vmul.f32 0.6931472, %v208_v0  ;;  %v210_v5 = vpop.eup %209 }
  0x58   :  { %v212_v9 = vpop.eup %211  ;;  %v132_v11 = vmul.f32 0.6931472, %v210_v5 }
  0x59   :  { %v137_v12 = vmul.f32 %v130_v3, %v77_v63  ;;  %v214_v13 = vpop.eup %213  ;;  %v134_v14 = vmul.f32 0.6931472, %v212_v9 }
  0x5a   :  { %v136_v16 = vmul.f32 0.6931472, %v214_v13  ;;  %v138_v17 = vmul.f32 %v132_v11, %v78_v2 }
  0x5b   :  { %v157_v19 = vmul.f32 %v153_v8, %v137_v12  ;;  %v139_v20 = vmul.f32 %v134_v14, %v79_v6 }
  0x5c   :  { %v140_v22 = vmul.f32 %v136_v16, %v80_v10  ;;  %v158_v23 = vmul.f32 %v154_v15, %v138_v17 }
  0x5d   :  { %v159_v24 = vmul.f32 %v155_v18, %v139_v20 }
  0x5e   :  { %v160_v26 = vmul.f32 %v156_v21, %v140_v22  ;;  %v161_v27 = vadd.f32 %v158_v23, %v157_v19 }
  0x60   :  { %v162_v28 = vadd.f32 %v161_v27, %v159_v24 }
  0x62   :  { %v163_v25 = vadd.f32 %v162_v28, %v160_v26 }
  0x64   :  { %166 = vst [vmem:[#allocation7] sm:$0xff] %v163_v25 }
  0x65   :  { %270 = shalt.err (!%p267_p6)
}
  0x66   :  { %s271_s20 = scalar_lea.hbm %s389_s4, 128 }
  0x67   :  { %p272_p7 = scmp.ne.s32.totalorder %s389_s4, %s271_s20  ;;  %p275_p8 = scmp.lt.u32.totalorder %s271_s20, %s389_s4 }
  0x69   :  { %p277_p9 = pnand %p275_p8, %p272_p7 }
  0x6b   :  { %280 = shalt.err (!%p277_p9)
}
  0x6c   :  { %176 = dma.vmem_to_hbm [thread:$0]  %s174_s3, 128, %s389_s4, [#allocation4]  }
  0x6d   :  { %285 = dma.done.wait [#allocation4], 128  }
  0x6e   :  { %286 = vsyncadd [#allocation4], 4294967168 }
  0x6f   :  { %180 = vsyncpa [#allocation3], 1 }
  0x70   :  { %181 = vsyncpa [#allocation6], 1 }
  0x71   :  { %182 = vsyncpa [#allocation4], 1 }

</bundles_post_ra>
